<compile_context>
chip_gen: v7x
topology: tpu7x:2x2x1
jax: 0.10.0
libtpu: 0.0.40
codegen_flags: <defaults>
</compile_context>

<pallas_src>
import jax
import jax.numpy as jnp
from jax.experimental import pallas as pl
from jax.experimental.pallas import tpu as pltpu


def _mlp_kernel(x_ref,
                w1_ref, b1_ref,
                w2_ref, b2_ref,
                w3_ref, b3_ref,
                w4_ref, b4_ref,
                o_ref):
    # Layer 1: Linear (bf16 MXU, f32 acc) + bias + ReLU (f32 VPU)
    h = jnp.dot(x_ref[...].astype(jnp.bfloat16), w1_ref[...],
                preferred_element_type=jnp.float32)
    h = jnp.maximum(h + b1_ref[...], 0.0)
    # Layer 2
    h = jnp.dot(h.astype(jnp.bfloat16), w2_ref[...],
                preferred_element_type=jnp.float32)
    h = jnp.maximum(h + b2_ref[...], 0.0)
    # Layer 3
    h = jnp.dot(h.astype(jnp.bfloat16), w3_ref[...],
                preferred_element_type=jnp.float32)
    h = jnp.maximum(h + b3_ref[...], 0.0)
    # Layer 4 (no activation)
    out = jnp.dot(h.astype(jnp.bfloat16), w4_ref[...],
                  preferred_element_type=jnp.float32)
    o_ref[...] = (out + b4_ref[...]).astype(o_ref.dtype)


def network3_forward(x, params, *, block_batch=512):
    """Run the fused MLP kernel. x: [batch, states] (float32)."""
    (w1, b1), (w2, b2), (w3, b3), (w4, b4) = params
    batch, states = x.shape
    hidden = w1.shape[1]
    actions = w4.shape[1]

    # Batch tile: as large as possible (largest intermediate is TB x 4*hidden,
    # a few hundred KB of f32), but never larger than the batch itself.
    tb = min(block_batch, batch)
    grid = (pl.cdiv(batch, tb),)

    def row_spec(cols):
        # Tiled along batch; `cols` equals the full minor dim, so no (8,128)
        # divisibility constraint applies to it.
        return pl.BlockSpec((tb, cols), lambda i: (i, 0))

    def resident(arr):
        # Whole-array block with a constant index_map -> fetched once,
        # VMEM-resident across all grid steps.
        return pl.BlockSpec(arr.shape, lambda i: tuple(0 for _ in arr.shape))

    weights_biases = (w1, b1, w2, b2, w3, b3, w4, b4)

    flops = 2 * batch * (states * hidden
                         + hidden * (2 * hidden)
                         + (2 * hidden) * (4 * hidden)
                         + (4 * hidden) * actions)
    bytes_accessed = (x.size * x.dtype.itemsize
                      + sum(int(a.size) * a.dtype.itemsize for a in weights_biases)
                      + batch * actions * 4)

    return pl.pallas_call(
        _mlp_kernel,
        out_shape=jax.ShapeDtypeStruct((batch, actions), jnp.float32),
        grid=grid,
        in_specs=[row_spec(states)] + [resident(a) for a in weights_biases],
        out_specs=row_spec(actions),
        compiler_params=pltpu.CompilerParams(
            dimension_semantics=("parallel",)),
        cost_estimate=pl.CostEstimate(flops=flops,
                                      transcendentals=0,
                                      bytes_accessed=bytes_accessed),
    )(x, *weights_biases)


def init_params(key, states, actions, hidden):
    """Deterministic parameter init matching Network_3 layer shapes.

    Weights are stored as (in, out) in bfloat16 (MXU operand dtype);
    biases as (1, out) in float32 for clean 2D broadcasting in f32.
    """
    dims = [(states, hidden),
            (hidden, hidden * 2),
            (hidden * 2, hidden * 4),
            (hidden * 4, actions)]
    params = []
    for i, (d_in, d_out) in enumerate(dims):
        kw, kb = jax.random.split(jax.random.fold_in(key, i))
        bound = 1.0 / jnp.sqrt(d_in)  # PyTorch nn.Linear default init range
        w = jax.random.uniform(kw, (d_in, d_out), jnp.float32, -bound, bound)
        b = jax.random.uniform(kb, (1, d_out), jnp.float32, -bound, bound)
        params.append((w.astype(jnp.bfloat16), b))
    return params


def reference_forward(x, params):
    """Plain-JAX reference with the same bf16-operand / f32-accumulate math."""
    h = x
    for i, (w, b) in enumerate(params):
        h = jnp.dot(h.astype(jnp.bfloat16), w.astype(jnp.bfloat16),
                    preferred_element_type=jnp.float32) + b
        if i < len(params) - 1:
            h = jnp.maximum(h, 0.0)
    return h


if __name__ == "__main__":
    # Shapes implied by the module: states=32, hidden=32, actions=8.
    # batch=256 with block_batch=128 exercises the batch grid (2 steps).
    states, actions, hidden, batch = 32, 8, 32, 256

    key = jax.random.PRNGKey(0)
    kx, kp = jax.random.split(key)
    x = jax.random.normal(kx, (batch, states), jnp.float32)
    params = init_params(kp, states, actions, hidden)

    out = network3_forward(x, params, block_batch=128)
    out = jax.block_until_ready(out)

    ref = reference_forward(x, params)
    assert out.shape == (batch, actions)
    assert jnp.allclose(out, ref, atol=1e-2, rtol=1e-2), "mismatch vs reference"

    print("KERNEL_OK")
</pallas_src>

<mosaic_0001>
module attributes {stable_mosaic.version = 11 : i64} {
  func.func @_mlp_kernel(%arg0: i32, %arg1: memref<128x32xf32, #tpu.memory_space<vmem>>, %arg2: memref<32x32xbf16, #tpu.memory_space<vmem>>, %arg3: memref<1x32xf32, #tpu.memory_space<vmem>>, %arg4: memref<32x64xbf16, #tpu.memory_space<vmem>>, %arg5: memref<1x64xf32, #tpu.memory_space<vmem>>, %arg6: memref<64x128xbf16, #tpu.memory_space<vmem>>, %arg7: memref<1x128xf32, #tpu.memory_space<vmem>>, %arg8: memref<128x8xbf16, #tpu.memory_space<vmem>>, %arg9: memref<1x8xf32, #tpu.memory_space<vmem>>, %arg10: memref<128x8xf32, #tpu.memory_space<vmem>>) attributes {dimension_semantics = [#tpu.dimension_semantics<parallel>], iteration_bounds = array<i64: 2>, scalar_prefetch = 0 : i64, scratch_operands = 0 : i64, tpu.core_type = #tpu.core_type<tc>, window_params = [{transform_indices = @transform_0, window_bounds = array<i64: 128, 32>}, {pipeline_mode = #tpu.pipeline_mode<synchronous>, transform_indices = @transform_1, window_bounds = array<i64: 32, 32>}, {pipeline_mode = #tpu.pipeline_mode<synchronous>, transform_indices = @transform_2, window_bounds = array<i64: 1, 32>}, {pipeline_mode = #tpu.pipeline_mode<synchronous>, transform_indices = @transform_3, window_bounds = array<i64: 32, 64>}, {pipeline_mode = #tpu.pipeline_mode<synchronous>, transform_indices = @transform_4, window_bounds = array<i64: 1, 64>}, {pipeline_mode = #tpu.pipeline_mode<synchronous>, transform_indices = @transform_5, window_bounds = array<i64: 64, 128>}, {pipeline_mode = #tpu.pipeline_mode<synchronous>, transform_indices = @transform_6, window_bounds = array<i64: 1, 128>}, {pipeline_mode = #tpu.pipeline_mode<synchronous>, transform_indices = @transform_7, window_bounds = array<i64: 128, 8>}, {pipeline_mode = #tpu.pipeline_mode<synchronous>, transform_indices = @transform_8, window_bounds = array<i64: 1, 8>}, {transform_indices = @transform_9, window_bounds = array<i64: 128, 8>}]} {
    %c0 = arith.constant 0 : index
    %c0_0 = arith.constant 0 : index
    %0 = vector.load %arg1[%c0, %c0_0] : memref<128x32xf32, #tpu.memory_space<vmem>>, vector<128x32xf32>
    %1 = arith.truncf %0 : vector<128x32xf32> to vector<128x32xbf16>
    %c0_1 = arith.constant 0 : index
    %c0_2 = arith.constant 0 : index
    %2 = vector.load %arg2[%c0_1, %c0_2] : memref<32x32xbf16, #tpu.memory_space<vmem>>, vector<32x32xbf16>
    %cst = arith.constant dense<0.000000e+00> : vector<128x32xf32>
    %3 = tpu.matmul %1, %2, %cst {dimension_numbers = #tpu.dot_dimension_numbers<[1], [0], [0], [1], [0, 0, 1, 1], [], []>} : vector<128x32xbf16>, vector<32x32xbf16>, vector<128x32xf32> -> vector<128x32xf32>
    %c0_3 = arith.constant 0 : index
    %c0_4 = arith.constant 0 : index
    %4 = vector.load %arg3[%c0_3, %c0_4] : memref<1x32xf32, #tpu.memory_space<vmem>>, vector<1x32xf32>
    %5 = vector.broadcast %4 : vector<1x32xf32> to vector<128x32xf32>
    %6 = arith.addf %3, %5 : vector<128x32xf32>
    %cst_5 = arith.constant 0.000000e+00 : f32
    %7 = vector.broadcast %cst_5 : f32 to vector<128x32xf32>
    %8 = arith.maximumf %6, %7 : vector<128x32xf32>
    %9 = arith.truncf %8 : vector<128x32xf32> to vector<128x32xbf16>
    %c0_6 = arith.constant 0 : index
    %c0_7 = arith.constant 0 : index
    %10 = vector.load %arg4[%c0_6, %c0_7] : memref<32x64xbf16, #tpu.memory_space<vmem>>, vector<32x64xbf16>
    %cst_8 = arith.constant dense<0.000000e+00> : vector<128x64xf32>
    %11 = tpu.matmul %9, %10, %cst_8 {dimension_numbers = #tpu.dot_dimension_numbers<[1], [0], [0], [1], [0, 0, 1, 1], [], []>} : vector<128x32xbf16>, vector<32x64xbf16>, vector<128x64xf32> -> vector<128x64xf32>
    %c0_9 = arith.constant 0 : index
    %c0_10 = arith.constant 0 : index
    %12 = vector.load %arg5[%c0_9, %c0_10] : memref<1x64xf32, #tpu.memory_space<vmem>>, vector<1x64xf32>
    %13 = vector.broadcast %12 : vector<1x64xf32> to vector<128x64xf32>
    %14 = arith.addf %11, %13 : vector<128x64xf32>
    %cst_11 = arith.constant 0.000000e+00 : f32
    %15 = vector.broadcast %cst_11 : f32 to vector<128x64xf32>
    %16 = arith.maximumf %14, %15 : vector<128x64xf32>
    %17 = arith.truncf %16 : vector<128x64xf32> to vector<128x64xbf16>
    %c0_12 = arith.constant 0 : index
    %c0_13 = arith.constant 0 : index
    %18 = vector.load %arg6[%c0_12, %c0_13] : memref<64x128xbf16, #tpu.memory_space<vmem>>, vector<64x128xbf16>
    %cst_14 = arith.constant dense<0.000000e+00> : vector<128x128xf32>
    %19 = tpu.matmul %17, %18, %cst_14 {dimension_numbers = #tpu.dot_dimension_numbers<[1], [0], [0], [1], [0, 0, 1, 1], [], []>} : vector<128x64xbf16>, vector<64x128xbf16>, vector<128x128xf32> -> vector<128x128xf32>
    %c0_15 = arith.constant 0 : index
    %c0_16 = arith.constant 0 : index
    %20 = vector.load %arg7[%c0_15, %c0_16] : memref<1x128xf32, #tpu.memory_space<vmem>>, vector<1x128xf32>
    %21 = vector.broadcast %20 : vector<1x128xf32> to vector<128x128xf32>
    %22 = arith.addf %19, %21 : vector<128x128xf32>
    %cst_17 = arith.constant 0.000000e+00 : f32
    %23 = vector.broadcast %cst_17 : f32 to vector<128x128xf32>
    %24 = arith.maximumf %22, %23 : vector<128x128xf32>
    %25 = arith.truncf %24 : vector<128x128xf32> to vector<128x128xbf16>
    %c0_18 = arith.constant 0 : index
    %c0_19 = arith.constant 0 : index
    %26 = vector.load %arg8[%c0_18, %c0_19] : memref<128x8xbf16, #tpu.memory_space<vmem>>, vector<128x8xbf16>
    %cst_20 = arith.constant dense<0.000000e+00> : vector<128x8xf32>
    %27 = tpu.matmul %25, %26, %cst_20 {dimension_numbers = #tpu.dot_dimension_numbers<[1], [0], [0], [1], [0, 0, 1, 1], [], []>} : vector<128x128xbf16>, vector<128x8xbf16>, vector<128x8xf32> -> vector<128x8xf32>
    %c0_21 = arith.constant 0 : index
    %c0_22 = arith.constant 0 : index
    %28 = vector.load %arg9[%c0_21, %c0_22] : memref<1x8xf32, #tpu.memory_space<vmem>>, vector<1x8xf32>
    %29 = vector.broadcast %28 : vector<1x8xf32> to vector<128x8xf32>
    %30 = arith.addf %27, %29 : vector<128x8xf32>
    %c0_23 = arith.constant 0 : index
    %c0_24 = arith.constant 0 : index
    %31 = vector.load %arg10[%c0_23, %c0_24] : memref<128x8xf32, #tpu.memory_space<vmem>>, vector<128x8xf32>
    tpu.vector_store %arg10[%c0_23, %c0_24], %30 {strides = array<i32>} : memref<128x8xf32, #tpu.memory_space<vmem>>, vector<128x8xf32>,
    return
  }
  func.func @transform_0(%arg0: i32) -> (i32, i32) {
    %c0_i32 = arith.constant 0 : i32
    %c0_i32_0 = arith.constant 0 : i32
    return %arg0, %c0_i32 : i32, i32
  }
  func.func @transform_1(%arg0: i32) -> (i32, i32) {
    %c0_i32 = arith.constant 0 : i32
    %c0_i32_0 = arith.constant 0 : i32
    %c0_i32_1 = arith.constant 0 : i32
    return %c0_i32, %c0_i32_0 : i32, i32
  }
  func.func @transform_2(%arg0: i32) -> (i32, i32) {
    %c0_i32 = arith.constant 0 : i32
    %c0_i32_0 = arith.constant 0 : i32
    %c0_i32_1 = arith.constant 0 : i32
    return %c0_i32, %c0_i32_0 : i32, i32
  }
  func.func @transform_3(%arg0: i32) -> (i32, i32) {
    %c0_i32 = arith.constant 0 : i32
    %c0_i32_0 = arith.constant 0 : i32
    %c0_i32_1 = arith.constant 0 : i32
    return %c0_i32, %c0_i32_0 : i32, i32
  }
  func.func @transform_4(%arg0: i32) -> (i32, i32) {
    %c0_i32 = arith.constant 0 : i32
    %c0_i32_0 = arith.constant 0 : i32
    %c0_i32_1 = arith.constant 0 : i32
    return %c0_i32, %c0_i32_0 : i32, i32
  }
  func.func @transform_5(%arg0: i32) -> (i32, i32) {
    %c0_i32 = arith.constant 0 : i32
    %c0_i32_0 = arith.constant 0 : i32
    %c0_i32_1 = arith.constant 0 : i32
    return %c0_i32, %c0_i32_0 : i32, i32
  }
  func.func @transform_6(%arg0: i32) -> (i32, i32) {
    %c0_i32 = arith.constant 0 : i32
    %c0_i32_0 = arith.constant 0 : i32
    %c0_i32_1 = arith.constant 0 : i32
    return %c0_i32, %c0_i32_0 : i32, i32
  }
  func.func @transform_7(%arg0: i32) -> (i32, i32) {
    %c0_i32 = arith.constant 0 : i32
    %c0_i32_0 = arith.constant 0 : i32
    %c0_i32_1 = arith.constant 0 : i32
    return %c0_i32, %c0_i32_0 : i32, i32
  }
  func.func @transform_8(%arg0: i32) -> (i32, i32) {
    %c0_i32 = arith.constant 0 : i32
    %c0_i32_0 = arith.constant 0 : i32
    %c0_i32_1 = arith.constant 0 : i32
    return %c0_i32, %c0_i32_0 : i32, i32
  }
  func.func @transform_9(%arg0: i32) -> (i32, i32) {
    %c0_i32 = arith.constant 0 : i32
    %c0_i32_0 = arith.constant 0 : i32
    return %arg0, %c0_i32 : i32, i32
  }
}

</mosaic_0001>

<bundles_post_ra>
// kernel: tpu_custom_call.1
= control target key start
LH: loop header
LB: loop body
LE: loop exit
PB: predicated region body
PF: predicated region fallthrough
CT: control target
= control target key end

     0   :  { %s1405_s30 = smov 0   ;;  %s1565_s0 = inlined_call_operand.vmem [shape: f32[256,32], index: 0, kind: input, shape index: {}]   ;;  %s1566_s1 = inlined_call_operand.vmem [shape: bf16[32,32], index: 1, kind: input, shape index: {}]   ;;  %s1567_s2 = inlined_call_operand.vmem [shape: f32[1,32], index: 2, kind: input, shape index: {}]   ;;  %s1568_s3 = inlined_call_operand.vmem [shape: bf16[32,64], index: 3, kind: input, shape index: {}]   ;;  %s1569_s4 = inlined_call_operand.vmem [shape: f32[1,64], index: 4, kind: input, shape index: {}]   ;;  %s1570_s5 = inlined_call_operand.vmem [shape: bf16[64,128], index: 5, kind: input, shape index: {}]   ;;  %s1571_s6 = inlined_call_operand.vmem [shape: f32[1,128], index: 6, kind: input, shape index: {}]   ;;  %s1572_s7 = inlined_call_operand.vmem [shape: bf16[128,8], index: 7, kind: input, shape index: {}]   ;;  %s1573_s8 = inlined_call_operand.vmem [shape: f32[1,8], index: 8, kind: input, shape index: {}]   ;;  %s1574_s9 = inlined_call_operand.vmem [shape: f32[256,8], index: 9, kind: output, shape index: {}]  }
   0x1 LB: > { %s1124_s10 = sadd.s32 4294967295, %s1353_s30   ;;  %p1128_p0 = scmp.ge.s32.totalorder %s1353_s30, 1  ;;  %s1353_s30 = sphi %s1405_s30, %s19_s30  }
   0x2   : > { %p288_p1 = scmp.lt.s32.totalorder %s1353_s30, 3 }
   0x4   : > { %p289_p2 = pnand %p1128_p0, %p288_p1 }
   0x5   : > { %v1331_v0 = vld [vmem:[%s1566_s1] sm:$0xff] (!%p289_p2)   ;;  %s1129_s13 = sshll.u32 (!%p289_p2), %s1124_s10, 4  ;;  %v1332_v1 = vld [vmem:[%s1566_s1 + $0x8] sm:$0xff] (!%p289_p2)   ;;  %vm384_vm0 = vcmask (!%p289_p2), 261120   ;;  %v1337_v30 = vld [vmem:[%s1570_s5 + $0x10] sm:$0xff] (!%p289_p2)   ;;  %vm737_vm1 = vcmask (!%p289_p2), 523264  }
   0x6   : > { %292 = sbr.rel (%p289_p2) target bundleno = 928 (0x3a0), region = 56  ;;  %p325_p3 = scmp.lt.s32.totalorder (!%p289_p2), %s1129_s13, 31  ;;  %1227 = vmatprep.subr.bf16.mxu0 (!%p289_p2), %v1331_v0  ;;  %v1333_v26 = vld [vmem:[%s1568_s3] sm:$0xff] (!%p289_p2)   ;;  %v1334_v27 = vld [vmem:[%s1568_s3 + $0x8] sm:$0xff] (!%p289_p2)   ;;  %vm1051_vm2 = vcmask (!%p289_p2), 64512  }
   0x7   : > { %1228 = vmatpush3.bf16.msra.mxu0 (!%p289_p2), %v1331_v0  ;;  %1247 = vmatprep.subr.bf16.mxu1 (!%p289_p2), %v1333_v26  ;;  %v1335_v28 = vld [vmem:[%s1570_s5] sm:$0xff] (!%p289_p2)   ;;  %v1336_v29 = vld [vmem:[%s1570_s5 + $0x8] sm:$0xff] (!%p289_p2)  }
   0x8   : > { %1229 = vmatprep.subr.bf16.mxu0 (!%p289_p2), %v1332_v1  ;;  %1248 = vmatpush3.bf16.msra.mxu1 (!%p289_p2), %v1333_v26  ;;  %v1133_v31 = vld [vmem:[%s1567_s2] ss:$0 sm:$0xff] (!%p289_p2)  ;;  %v1340_v26 = vld [vmem:[%s1572_s7 + $0x8] sm:$0xff] (!%p289_p2)  }
   0x9   : > { %1249 = vmatprep.subr.bf16.mxu1 (!%p289_p2), %v1334_v27 }
   0xb   : > { %1230 = vmatpush3.bf16.msra.mxu0 (!%p289_p2), %v1332_v1 }
   0xc   : > { %1250 = vmatpush3.bf16.msra.mxu1 (!%p289_p2), %v1334_v27  ;;  %1267 = vmatprep.subr.bf16.mxu0 (!%p289_p2), %v1335_v28  ;;  %v1341_v27 = vld [vmem:[%s1572_s7 + $0x10] sm:$0xff] (!%p289_p2)  }
   0xd   : > { %s1576_s13 = smov (!%p325_p3, %s1129_s13), 31 }
   0xe   : > { %s1130_s16 = sshll.u32 %s1576_s13, 3 }
   0xf   : > { %s1427_s19 = scalar_lea.vmem %s1565_s0, %s1130_s16  ;;  %s1528_s22 = scalar_lea.vmem %s1574_s9, %s1130_s16 }
  0x10   : > { %v337_v2 = vld [vmem:[%s1427_s19] sm:$0xff]  ;;  %v338_v3 = vld [vmem:[%s1427_s19 + $0x8] sm:$0xff]  ;;  %v339_v4 = vld [vmem:[%s1427_s19 + $0x10] sm:$0xff] }
  0x11   : > { %v353_v5 = vpack.c.bf16 %v338_v3, %v337_v2  ;;  %v340_v6 = vld [vmem:[%s1427_s19 + $0x18] sm:$0xff]  ;;  %v341_v7 = vld [vmem:[%s1427_s19 + $0x20] sm:$0xff]  ;;  %v342_v8 = vld [vmem:[%s1427_s19 + $0x28] sm:$0xff] }
  0x12   : > { %v354_v9 = vpack.c.bf16 %v340_v6, %v339_v4  ;;  %v355_v10 = vpack.c.bf16 %v342_v8, %v341_v7  ;;  %v343_v11 = vld [vmem:[%s1427_s19 + $0x30] sm:$0xff]  ;;  %v344_v12 = vld [vmem:[%s1427_s19 + $0x38] sm:$0xff]  ;;  %v345_v13 = vld [vmem:[%s1427_s19 + $0x40] sm:$0xff] }
  0x13   : > { %1231 = vmatprep.mubr.msk.bf16.mxu0 %vm384_vm0, %v353_v5  ;;  %v346_v14 = vld [vmem:[%s1427_s19 + $0x48] sm:$0xff]  ;;  %v356_v15 = vpack.c.bf16 %v344_v12, %v343_v11  ;;  %v347_v17 = vld [vmem:[%s1427_s19 + $0x50] sm:$0xff]  ;;  %v348_v18 = vld [vmem:[%s1427_s19 + $0x58] sm:$0xff] }
  0x14   : > { %1232 = vmatmul.mubr.msk.bf16.vlgmr.msra.gmra.mrb[0].mxu0 %vm384_vm0, %v354_v9  ;;  %v357_v16 = vpack.c.bf16 %v346_v14, %v345_v13  ;;  %v349_v19 = vld [vmem:[%s1427_s19 + $0x60] sm:$0xff]  ;;  %v350_v20 = vld [vmem:[%s1427_s19 + $0x68] sm:$0xff]  ;;  %v358_v21 = vpack.c.bf16 %v348_v18, %v347_v17  ;;  %v351_v23 = vld [vmem:[%s1427_s19 + $0x70] sm:$0xff] }
  0x15   : > { %1235 = vmatprep.mubr.msk.bf16.mxu0 %vm384_vm0, %v355_v10  ;;  %v359_v22 = vpack.c.bf16 %v350_v20, %v349_v19  ;;  %v352_v24 = vld [vmem:[%s1427_s19 + $0x78] sm:$0xff]  ;;  %1268 = vmatpush3.bf16.msra.mxu0 %v1335_v28 }
  0x16   : > { %v360_v25 = vpack.c.bf16 %v352_v24, %v351_v23  ;;  %1269 = vmatprep.subr.bf16.mxu0 %v1336_v29  ;;  %v1338_v24 = vld [vmem:[%s1570_s5 + $0x18] sm:$0xff]  }
  0x17   : > { %v1342_v28 = vld [vmem:[%s1572_s7 + $0x18] sm:$0xff]  }
  0x19   : > { %1270 = vmatpush3.bf16.msra.mxu0 %v1336_v29  ;;  %v1343_v29 = vld [vmem:[%s1572_s7 + $0x20] sm:$0xff]  }
  0x1a   : > { %1271 = vmatprep.subr.bf16.mxu0 %v1337_v30 }
  0x1c   : > { %1236 = vmatmul.mubr.msk.bf16.gmra.mrb[4].mxu0 %vm384_vm0, %v356_v15 }
  0x1d   : > { %1239 = vmatprep.mubr.msk.bf16.mxu0 %vm384_vm0, %v357_v16  ;;  %1272 = vmatpush3.bf16.msra.mxu0 %v1337_v30  ;;  %v1344_v30 = vld [vmem:[%s1572_s7 + $0x28] sm:$0xff]  }
  0x1e   : > { %1273 = vmatprep.subr.bf16.mxu0 %v1338_v24 }
  0x21   : > { %1274 = vmatpush3.bf16.msra.mxu0 %v1338_v24  ;;  %v1345_v24 = vld [vmem:[%s1572_s7 + $0x30] sm:$0xff]  }
  0x24   : > { %1240 = vmatmul.mubr.msk.bf16.gmra.mrb[8].mxu0 %vm384_vm0, %v358_v21 }
  0x25   : > { %1243 = vmatprep.mubr.msk.bf16.mxu0 %vm384_vm0, %v359_v22 }
  0x2c   : > { %1244 = vmatmul.mubr.msk.bf16.gmra.mrb[12].mxu0 %vm384_vm0, %v360_v25  ;;  %v1339_v25 = vld [vmem:[%s1572_s7] sm:$0xff]  }
  0x2d   : > { %1291 = vmatprep.subr.bf16.mxu1 %v1339_v25 }
  0xe7   : > { %v1233_v32 = vpop.f32.mrb[0].mxu0 }
  0xe8   : > { %v452_v33 = vadd.f32 %v1233_v32, %v1133_v31  ;;  %v443_v34 = vpop.f32.mrb[1].mxu0 }
  0xe9   : > { %v444_v35 = vadd.f32 %v1133_v31, %v443_v34  ;;  %v1234_v36 = vpop.f32.mrb[2].mxu0 }
  0xea   : > { %v455_v37 = vadd.f32 %v1234_v36, %v1133_v31  ;;  %v446_v38 = vpop.f32.mrb[3].mxu0  ;;  %v508_v40 = vmax.f32 %v452_v33, 0.0 }
  0xeb   : > { %v447_v39 = vadd.f32 %v1133_v31, %v446_v38  ;;  %v506_v42 = vmax.f32 %v444_v35, 0.0 }
  0xec   : > { %v509_v41 = vmax.f32 %v455_v37, 0.0 }
  0xed   : > { %v507_v43 = vmax.f32 %v447_v39, 0.0 }
  0xee   : > { %v523_v44 = vpack.c.bf16 %v509_v41, %v508_v40 }
  0xef   : > { %v1237_v45 = vpop.f32.mrb[4].mxu0  ;;  %v522_v46 = vpack.c.bf16 %v507_v43, %v506_v42 }
  0xf0   : > { %v468_v47 = vadd.f32 %v1237_v45, %v1133_v31  ;;  %v459_v48 = vpop.f32.mrb[5].mxu0 }
  0xf1   : > { %v460_v49 = vadd.f32 %v1133_v31, %v459_v48  ;;  %v1238_v50 = vpop.f32.mrb[6].mxu0  ;;  %1251 = vmatprep.mubr.msk.bf16.mxu1 %vm384_vm0, %v522_v46 }
  0xf2   : > { %v471_v51 = vadd.f32 %v1238_v50, %v1133_v31  ;;  %v462_v52 = vpop.f32.mrb[7].mxu0  ;;  %1252 = vmatmul.mubr.msk.bf16.vlgmr.msra.gmra.mrb[0].mxu1 %vm384_vm0, %v523_v44  ;;  %v512_v54 = vmax.f32 %v468_v47, 0.0 }
  0xf3   : > { %v463_v53 = vadd.f32 %v1133_v31, %v462_v52  ;;  %v510_v56 = vmax.f32 %v460_v49, 0.0  ;;  %1292 = vmatpush3.bf16.msra.mxu1 %v1339_v25  ;;  %v1346_v25 = vld [vmem:[%s1572_s7 + $0x38] sm:$0xff]  }
  0xf4   : > { %v513_v55 = vmax.f32 %v471_v51, 0.0  ;;  %1293 = vmatprep.subr.bf16.mxu1 %v1340_v26 }
  0xf5   : > { %v511_v57 = vmax.f32 %v463_v53, 0.0 }
  0xf6   : > { %v525_v58 = vpack.c.bf16 %v513_v55, %v512_v54 }
  0xf7   : > { %v524_v59 = vpack.c.bf16 %v511_v57, %v510_v56  ;;  %v1241_v60 = vpop.f32.mrb[8].mxu0  ;;  %1294 = vmatpush3.bf16.msra.mxu1 %v1340_v26  ;;  %v1155_v26 = vld [vmem:[%s1571_s6] ss:$0 sm:$0xff] }
  0xf8   : > { %v484_v61 = vadd.f32 %v1241_v60, %v1133_v31  ;;  %v475_v62 = vpop.f32.mrb[9].mxu0  ;;  %1295 = vmatprep.subr.bf16.mxu1 %v1341_v27 }
  0xf9   : > { %v476_v63 = vadd.f32 %v1133_v31, %v475_v62  ;;  %v1242_v0 = vpop.f32.mrb[10].mxu0  ;;  %1255 = vmatprep.mubr.msk.bf16.mxu1 %vm384_vm0, %v524_v59 }
  0xfa   : > { %v487_v1 = vadd.f32 %v1242_v0, %v1133_v31  ;;  %v478_v2 = vpop.f32.mrb[11].mxu0  ;;  %1256 = vmatmul.mubr.msk.bf16.gmra.mrb[4].mxu1 %vm384_vm0, %v525_v58  ;;  %v516_v4 = vmax.f32 %v484_v61, 0.0 }
  0xfb   : > { %v479_v3 = vadd.f32 %v1133_v31, %v478_v2  ;;  %v514_v6 = vmax.f32 %v476_v63, 0.0  ;;  %1296 = vmatpush3.bf16.msra.mxu1 %v1341_v27 }
  0xfc   : > { %v517_v5 = vmax.f32 %v487_v1, 0.0  ;;  %1297 = vmatprep.subr.bf16.mxu1 %v1342_v28 }
  0xfd   : > { %v515_v7 = vmax.f32 %v479_v3, 0.0 }
  0xfe   : > { %v527_v8 = vpack.c.bf16 %v517_v5, %v516_v4 }
  0xff   : > { %v526_v9 = vpack.c.bf16 %v515_v7, %v514_v6  ;;  %v1245_v10 = vpop.f32.mrb[12].mxu0  ;;  %1298 = vmatpush3.bf16.msra.mxu1 %v1342_v28 }
 0x100   : > { %v500_v11 = vadd.f32 %v1245_v10, %v1133_v31  ;;  %v491_v12 = vpop.f32.mrb[13].mxu0  ;;  %1299 = vmatprep.subr.bf16.mxu1 %v1343_v29 }
 0x101   : > { %v492_v13 = vadd.f32 %v1133_v31, %v491_v12  ;;  %v1246_v14 = vpop.f32.mrb[14].mxu0  ;;  %1259 = vmatprep.mubr.msk.bf16.mxu1 %vm384_vm0, %v526_v9 }
 0x102   : > { %v503_v15 = vadd.f32 %v1246_v14, %v1133_v31  ;;  %v494_v16 = vpop.f32.mrb[15].mxu0  ;;  %1260 = vmatmul.mubr.msk.bf16.gmra.mrb[8].mxu1 %vm384_vm0, %v527_v8  ;;  %v520_v18 = vmax.f32 %v500_v11, 0.0 }
 0x103   : > { %v495_v17 = vadd.f32 %v1133_v31, %v494_v16  ;;  %v518_v20 = vmax.f32 %v492_v13, 0.0  ;;  %1300 = vmatpush3.bf16.msra.mxu1 %v1343_v29  ;;  %v1144_v31 = vld [vmem:[%s1569_s4] ss:$0 sm:$0xff] }
 0x104   : > { %v521_v19 = vmax.f32 %v503_v15, 0.0  ;;  %1301 = vmatprep.subr.bf16.mxu1 %v1344_v30 }
 0x105   : > { %v519_v21 = vmax.f32 %v495_v17, 0.0 }
 0x106   : > { %v529_v22 = vpack.c.bf16 %v521_v19, %v520_v18 }
 0x107   : > { %v528_v23 = vpack.c.bf16 %v519_v21, %v518_v20  ;;  %1302 = vmatpush3.bf16.msra.mxu1 %v1344_v30 }
 0x108   : > { %1303 = vmatprep.subr.bf16.mxu1 %v1345_v24 }
 0x109   : > { %1263 = vmatprep.mubr.msk.bf16.mxu1 %vm384_vm0, %v528_v23 }
 0x10a   : > { %1264 = vmatmul.mubr.msk.bf16.gmra.mrb[12].mxu1 %vm384_vm0, %v529_v22 }
 0x10b   : > { %1304 = vmatpush3.bf16.msra.mxu1 %v1345_v24 }
 0x10c   : > { %1305 = vmatprep.subr.bf16.mxu1 %v1346_v25 }
 0x10f   : > { %1306 = vmatpush3.bf16.msra.mxu1 %v1346_v25 }
 0x1c5   : > { %v1253_v32 = vpop.f32.mrb[0].mxu1 }
 0x1c6   : > { %v620_v33 = vadd.f32 %v1253_v32, %v1144_v31  ;;  %v611_v34 = vpop.f32.mrb[1].mxu1 }
 0x1c7   : > { %v612_v35 = vadd.f32 %v1144_v31, %v611_v34  ;;  %v1254_v36 = vpop.f32.mrb[2].mxu1 }
 0x1c8   : > { %v623_v37 = vadd.f32 %v1254_v36, %v1144_v31  ;;  %v614_v38 = vpop.f32.mrb[3].mxu1  ;;  %v676_v40 = vmax.f32 %v620_v33, 0.0 }
 0x1c9   : > { %v615_v39 = vadd.f32 %v1144_v31, %v614_v38  ;;  %v674_v42 = vmax.f32 %v612_v35, 0.0 }
 0x1ca   : > { %v677_v41 = vmax.f32 %v623_v37, 0.0 }
 0x1cb   : > { %v675_v43 = vmax.f32 %v615_v39, 0.0 }
 0x1cc   : > { %v691_v44 = vpack.c.bf16 %v677_v41, %v676_v40 }
 0x1cd   : > { %v690_v45 = vpack.c.bf16 %v675_v43, %v674_v42  ;;  %v1257_v46 = vpop.f32.mrb[4].mxu1 }
 0x1ce   : > { %v636_v47 = vadd.f32 %v1257_v46, %v1144_v31  ;;  %v627_v48 = vpop.f32.mrb[5].mxu1 }
 0x1cf   : > { %v628_v49 = vadd.f32 %v1144_v31, %v627_v48  ;;  %v1258_v50 = vpop.f32.mrb[6].mxu1  ;;  %1275 = vmatprep.mubr.msk.bf16.mxu0 %vm737_vm1, %v690_v45 }
 0x1d0   : > { %v639_v51 = vadd.f32 %v1258_v50, %v1144_v31  ;;  %v630_v52 = vpop.f32.mrb[7].mxu1  ;;  %1276 = vmatmul.mubr.msk.bf16.vlgmr.msra.gmra.mrb[16].mxu0 %vm737_vm1, %v691_v44  ;;  %v680_v54 = vmax.f32 %v636_v47, 0.0 }
 0x1d1   : > { %v631_v53 = vadd.f32 %v1144_v31, %v630_v52  ;;  %v678_v56 = vmax.f32 %v628_v49, 0.0 }
 0x1d2   : > { %v681_v55 = vmax.f32 %v639_v51, 0.0 }
 0x1d3   : > { %v679_v57 = vmax.f32 %v631_v53, 0.0 }
 0x1d4   : > { %v693_v58 = vpack.c.bf16 %v681_v55, %v680_v54 }
 0x1d5   : > { %v692_v59 = vpack.c.bf16 %v679_v57, %v678_v56  ;;  %v1261_v60 = vpop.f32.mrb[8].mxu1 }
 0x1d6   : > { %v652_v61 = vadd.f32 %v1261_v60, %v1144_v31  ;;  %v643_v62 = vpop.f32.mrb[9].mxu1 }
 0x1d7   : > { %v644_v63 = vadd.f32 %v1144_v31, %v643_v62  ;;  %v1262_v0 = vpop.f32.mrb[10].mxu1  ;;  %1279 = vmatprep.mubr.msk.bf16.mxu0 %vm737_vm1, %v692_v59 }
 0x1d8   : > { %v655_v1 = vadd.f32 %v1262_v0, %v1144_v31  ;;  %v646_v2 = vpop.f32.mrb[11].mxu1  ;;  %1280 = vmatmul.mubr.msk.bf16.gmra.mrb[20].mxu0 %vm737_vm1, %v693_v58  ;;  %v684_v4 = vmax.f32 %v652_v61, 0.0 }
 0x1d9   : > { %v647_v3 = vadd.f32 %v1144_v31, %v646_v2  ;;  %v682_v6 = vmax.f32 %v644_v63, 0.0 }
 0x1da   : > { %v685_v5 = vmax.f32 %v655_v1, 0.0 }
 0x1db   : > { %v683_v7 = vmax.f32 %v647_v3, 0.0 }
 0x1dc   : > { %v695_v8 = vpack.c.bf16 %v685_v5, %v684_v4 }
 0x1dd   : > { %v694_v9 = vpack.c.bf16 %v683_v7, %v682_v6  ;;  %v1265_v10 = vpop.f32.mrb[12].mxu1 }
 0x1de   : > { %v668_v11 = vadd.f32 %v1265_v10, %v1144_v31  ;;  %v659_v12 = vpop.f32.mrb[13].mxu1 }
 0x1df   : > { %v660_v13 = vadd.f32 %v1144_v31, %v659_v12  ;;  %v1266_v14 = vpop.f32.mrb[14].mxu1  ;;  %1283 = vmatprep.mubr.msk.bf16.mxu0 %vm737_vm1, %v694_v9 }
 0x1e0   : > { %v671_v15 = vadd.f32 %v1266_v14, %v1144_v31  ;;  %v662_v16 = vpop.f32.mrb[15].mxu1  ;;  %1284 = vmatmul.mubr.msk.bf16.gmra.mrb[24].mxu0 %vm737_vm1, %v695_v8  ;;  %v688_v18 = vmax.f32 %v668_v11, 0.0 }
 0x1e1   : > { %v663_v17 = vadd.f32 %v1144_v31, %v662_v16  ;;  %v686_v20 = vmax.f32 %v660_v13, 0.0 }
 0x1e2   : > { %v689_v19 = vmax.f32 %v671_v15, 0.0 }
 0x1e3   : > { %v687_v21 = vmax.f32 %v663_v17, 0.0 }
 0x1e4   : > { %v697_v22 = vpack.c.bf16 %v689_v19, %v688_v18  ;;  %v1168_v19 = vld [vmem:[%s1573_s8] ss:$0 sm:$0xff] }
 0x1e5   : > { %v696_v23 = vpack.c.bf16 %v687_v21, %v686_v20 }
 0x1e7   : > { %1287 = vmatprep.mubr.msk.bf16.mxu0 %vm737_vm1, %v696_v23 }
 0x1e8   : > { %1288 = vmatmul.mubr.msk.bf16.gmra.mrb[28].mxu0 %vm737_vm1, %v697_v22 }
 0x2a3   : > { %v1277_v27 = vpop.f32.mrb[16].mxu0 }
 0x2a4   : > { %v805_v28 = vadd.f32 %v1277_v27, %v1155_v26  ;;  %v796_v29 = vpop.f32.mrb[17].mxu0 }
 0x2a5   : > { %v797_v30 = vadd.f32 %v1155_v26, %v796_v29  ;;  %v1278_v31 = vpop.f32.mrb[18].mxu0 }
 0x2a6   : > { %v808_v32 = vadd.f32 %v1278_v31, %v1155_v26  ;;  %v799_v33 = vpop.f32.mrb[19].mxu0  ;;  %v861_v35 = vmax.f32 %v805_v28, 0.0 }
 0x2a7   : > { %v800_v34 = vadd.f32 %v1155_v26, %v799_v33  ;;  %v859_v37 = vmax.f32 %v797_v30, 0.0 }
 0x2a8   : > { %v862_v36 = vmax.f32 %v808_v32, 0.0 }
 0x2a9   : > { %v860_v38 = vmax.f32 %v800_v34, 0.0 }
 0x2aa   : > { %v876_v39 = vpack.c.bf16 %v862_v36, %v861_v35 }
 0x2ab   : > { %v875_v40 = vpack.c.bf16 %v860_v38, %v859_v37  ;;  %v1281_v41 = vpop.f32.mrb[20].mxu0 }
 0x2ac   : > { %v821_v42 = vadd.f32 %v1281_v41, %v1155_v26  ;;  %v812_v43 = vpop.f32.mrb[21].mxu0 }
 0x2ad   : > { %v813_v44 = vadd.f32 %v1155_v26, %v812_v43  ;;  %v1282_v45 = vpop.f32.mrb[22].mxu0  ;;  %1307 = vmatprep.mubr.bf16.mxu1 %v875_v40 }
 0x2ae   : > { %v824_v46 = vadd.f32 %v1282_v45, %v1155_v26  ;;  %v815_v47 = vpop.f32.mrb[23].mxu0  ;;  %1308 = vmatmul.mubr.bf16.vlgmr.msra.gmra.mrb[16].mxu1 %v876_v39  ;;  %v865_v49 = vmax.f32 %v821_v42, 0.0 }
 0x2af   : > { %v816_v48 = vadd.f32 %v1155_v26, %v815_v47  ;;  %v863_v51 = vmax.f32 %v813_v44, 0.0 }
 0x2b0   : > { %v866_v50 = vmax.f32 %v824_v46, 0.0 }
 0x2b1   : > { %v864_v52 = vmax.f32 %v816_v48, 0.0 }
 0x2b2   : > { %v878_v53 = vpack.c.bf16 %v866_v50, %v865_v49 }
 0x2b3   : > { %v877_v54 = vpack.c.bf16 %v864_v52, %v863_v51  ;;  %v1285_v55 = vpop.f32.mrb[24].mxu0 }
 0x2b4   : > { %v837_v56 = vadd.f32 %v1285_v55, %v1155_v26  ;;  %v828_v57 = vpop.f32.mrb[25].mxu0 }
 0x2b5   : > { %v829_v58 = vadd.f32 %v1155_v26, %v828_v57  ;;  %v1286_v59 = vpop.f32.mrb[26].mxu0  ;;  %1311 = vmatprep.mubr.bf16.mxu1 %v877_v54 }
 0x2b6   : > { %v840_v60 = vadd.f32 %v1286_v59, %v1155_v26  ;;  %v831_v61 = vpop.f32.mrb[27].mxu0  ;;  %1312 = vmatmul.mubr.bf16.gmra.mrb[20].mxu1 %v878_v53  ;;  %v869_v63 = vmax.f32 %v837_v56, 0.0 }
 0x2b7   : > { %v832_v62 = vadd.f32 %v1155_v26, %v831_v61  ;;  %v867_v1 = vmax.f32 %v829_v58, 0.0 }
 0x2b8   : > { %v870_v0 = vmax.f32 %v840_v60, 0.0 }
 0x2b9   : > { %v868_v2 = vmax.f32 %v832_v62, 0.0 }
 0x2ba   : > { %v880_v3 = vpack.c.bf16 %v870_v0, %v869_v63 }
 0x2bb   : > { %v879_v4 = vpack.c.bf16 %v868_v2, %v867_v1  ;;  %v1289_v5 = vpop.f32.mrb[28].mxu0 }
 0x2bc   : > { %v853_v6 = vadd.f32 %v1289_v5, %v1155_v26  ;;  %v844_v7 = vpop.f32.mrb[29].mxu0 }
 0x2bd   : > { %v845_v8 = vadd.f32 %v1155_v26, %v844_v7  ;;  %v1290_v9 = vpop.f32.mrb[30].mxu0  ;;  %1315 = vmatprep.mubr.bf16.mxu1 %v879_v4 }
 0x2be   : > { %v856_v10 = vadd.f32 %v1290_v9, %v1155_v26  ;;  %v847_v11 = vpop.f32.mrb[31].mxu0  ;;  %1316 = vmatmul.mubr.bf16.gmra.mrb[24].mxu1 %v880_v3  ;;  %v873_v13 = vmax.f32 %v853_v6, 0.0 }
 0x2bf   : > { %v848_v12 = vadd.f32 %v1155_v26, %v847_v11  ;;  %v871_v15 = vmax.f32 %v845_v8, 0.0 }
 0x2c0   : > { %v874_v14 = vmax.f32 %v856_v10, 0.0 }
 0x2c1   : > { %v872_v16 = vmax.f32 %v848_v12, 0.0 }
 0x2c2   : > { %v882_v17 = vpack.c.bf16 %v874_v14, %v873_v13 }
 0x2c3   : > { %v881_v18 = vpack.c.bf16 %v872_v16, %v871_v15 }
 0x2c5   : > { %1319 = vmatprep.mubr.bf16.mxu1 %v881_v18 }
 0x2c6   : > { %1320 = vmatmul.mubr.bf16.gmra.mrb[28].mxu1 %v882_v17 }
 0x381   : > { %v1309_v20 = vpop.f32.mrb[16].mxu1 }
 0x382   : > { %v997_v21 = vadd.f32 %v1309_v20, %v1168_v19  ;;  %v988_v22 = vpop.f32.mrb[17].mxu1 }
 0x383   : > { %v989_v23 = vadd.f32 %v1168_v19, %v988_v22  ;;  %v1310_v24 = vpop.f32.mrb[18].mxu1 }
 0x384   : > { %1054 = vst.msk [vmem:[%s1528_s22 + $0x10] sm:$0xff] %vm1051_vm2, %v997_v21  ;;  %v1000_v25 = vadd.f32 %v1310_v24, %v1168_v19  ;;  %v991_v26 = vpop.f32.mrb[19].mxu1 }
 0x385   : > { %1052 = vst.msk [vmem:[%s1528_s22] sm:$0xff] %vm1051_vm2, %v989_v23  ;;  %v992_v27 = vadd.f32 %v1168_v19, %v991_v26 }
 0x386   : > { %1055 = vst.msk [vmem:[%s1528_s22 + $0x18] sm:$0xff] %vm1051_vm2, %v1000_v25 }
 0x387   : > { %1053 = vst.msk [vmem:[%s1528_s22 + $0x8] sm:$0xff] %vm1051_vm2, %v992_v27 }
 0x389   : > { %v1313_v28 = vpop.f32.mrb[20].mxu1 }
 0x38a   : > { %v1013_v29 = vadd.f32 %v1313_v28, %v1168_v19  ;;  %v1004_v30 = vpop.f32.mrb[21].mxu1 }
 0x38b   : > { %v1005_v31 = vadd.f32 %v1168_v19, %v1004_v30  ;;  %v1314_v32 = vpop.f32.mrb[22].mxu1 }
 0x38c   : > { %1058 = vst.msk [vmem:[%s1528_s22 + $0x30] sm:$0xff] %vm1051_vm2, %v1013_v29  ;;  %v1016_v33 = vadd.f32 %v1314_v32, %v1168_v19  ;;  %v1007_v34 = vpop.f32.mrb[23].mxu1 }
 0x38d   : > { %1056 = vst.msk [vmem:[%s1528_s22 + $0x20] sm:$0xff] %vm1051_vm2, %v1005_v31  ;;  %v1008_v35 = vadd.f32 %v1168_v19, %v1007_v34 }
 0x38e   : > { %1059 = vst.msk [vmem:[%s1528_s22 + $0x38] sm:$0xff] %vm1051_vm2, %v1016_v33 }
 0x38f   : > { %1057 = vst.msk [vmem:[%s1528_s22 + $0x28] sm:$0xff] %vm1051_vm2, %v1008_v35 }
 0x391   : > { %v1317_v36 = vpop.f32.mrb[24].mxu1 }
 0x392   : > { %v1029_v37 = vadd.f32 %v1317_v36, %v1168_v19  ;;  %v1020_v38 = vpop.f32.mrb[25].mxu1 }
 0x393   : > { %v1021_v39 = vadd.f32 %v1168_v19, %v1020_v38  ;;  %v1318_v40 = vpop.f32.mrb[26].mxu1 }
 0x394   : > { %1062 = vst.msk [vmem:[%s1528_s22 + $0x50] sm:$0xff] %vm1051_vm2, %v1029_v37  ;;  %v1032_v41 = vadd.f32 %v1318_v40, %v1168_v19  ;;  %v1023_v42 = vpop.f32.mrb[27].mxu1 }
 0x395   : > { %1060 = vst.msk [vmem:[%s1528_s22 + $0x40] sm:$0xff] %vm1051_vm2, %v1021_v39  ;;  %v1024_v43 = vadd.f32 %v1168_v19, %v1023_v42 }
 0x396   : > { %1063 = vst.msk [vmem:[%s1528_s22 + $0x58] sm:$0xff] %vm1051_vm2, %v1032_v41 }
 0x397   : > { %1061 = vst.msk [vmem:[%s1528_s22 + $0x48] sm:$0xff] %vm1051_vm2, %v1024_v43 }
 0x399   : > { %v1321_v44 = vpop.f32.mrb[28].mxu1 }
 0x39a   : > { %v1045_v45 = vadd.f32 %v1321_v44, %v1168_v19  ;;  %v1036_v46 = vpop.f32.mrb[29].mxu1 }
 0x39b   : > { %v1037_v47 = vadd.f32 %v1168_v19, %v1036_v46  ;;  %v1322_v48 = vpop.f32.mrb[30].mxu1 }
 0x39c   : > { %1066 = vst.msk [vmem:[%s1528_s22 + $0x70] sm:$0xff] %vm1051_vm2, %v1045_v45  ;;  %v1048_v49 = vadd.f32 %v1322_v48, %v1168_v19  ;;  %v1039_v50 = vpop.f32.mrb[31].mxu1 }
 0x39d   : > { %1064 = vst.msk [vmem:[%s1528_s22 + $0x60] sm:$0xff] %vm1051_vm2, %v1037_v47  ;;  %v1040_v51 = vadd.f32 %v1168_v19, %v1039_v50 }
 0x39e   : > { %1067 = vst.msk [vmem:[%s1528_s22 + $0x78] sm:$0xff] %vm1051_vm2, %v1048_v49 }
 0x39f   : > { %1065 = vst.msk [vmem:[%s1528_s22 + $0x68] sm:$0xff] %vm1051_vm2, %v1040_v51 }
 0x3a0 PF: > { %s19_s30 = sadd.s32 1, %s1353_s30  }
 0x3a1   : > { %p16_p4 = scmp.ge.s32.totalorder %s19_s30, 4  }
 0x3a3   :  { %18 = sbr.rel (!%p16_p4) target bundleno = 1 (0x1), region = 86 }

</bundles_post_ra>
